<compile_context>
chip_gen: v6e
topology: v6e:2x2x1
jax: 0.10.0
libtpu: 0.0.40
codegen_flags: <defaults>
</compile_context>

<pallas_src>
import functools

import jax
import jax.numpy as jnp
from jax import lax
from jax.experimental import pallas as pl
from jax.experimental.pallas import tpu as pltpu

_LANES = 128
_SINGLE_BLOCK_MAX_N = 512          # padded body count above which the tiled path is used
_MATMUL_PRECISION = lax.Precision.DEFAULT


def _round_up(x, m):
    return ((x + m - 1) // m) * m


def _pad_lanes(x, n_pad):
    n = x.shape[-1]
    if n_pad == n:
        return x
    return jnp.pad(x, ((0, 0), (0, n_pad - n)))


# --------------------------------------------------------------------------------------
# Single-block kernel: whole system resident in VMEM, `num_steps` timesteps fused.
# --------------------------------------------------------------------------------------
def _nbody_fused_kernel(params_ref, aug_ref, vel_ref, pos_out_ref, vel_out_ref,
                        *, n, d, num_steps):
    n_pad = aug_ref.shape[1]
    Gf = params_ref[0]
    dtf = params_ref[1]
    base = params_ref[2]                       # d * softening

    # Hoisted mask: diagonal + padded rows/columns (shared by every fused step).
    ii = lax.broadcasted_iota(jnp.int32, (n_pad, n_pad), 0)
    jj = lax.broadcasted_iota(jnp.int32, (n_pad, n_pad), 1)
    mask = (ii == jj) | (ii >= n) | (jj >= n)

    def step(carry):
        # aug: (d+1, n_pad) = [pos_t ; ones-row], vel: (d+1, n_pad) with zero last row.
        aug, vel = carry
        pos_col = jnp.transpose(aug)                              # (n_pad, d+1), XLU

        # r2[a, b] = sum_k (pos[a,k] - pos[b,k])^2 + d*softening  (base folded into k=0)
        dx = pos_col[:, 0:1] - aug[0:1, :]
        r2 = dx * dx + base
        for k in range(1, d):
            dxk = pos_col[:, k:k + 1] - aug[k:k + 1, :]
            r2 = r2 + dxk * dxk

        rs = lax.rsqrt(r2)                                        # EUP slot
        inv = jnp.where(mask, jnp.float32(0.0), Gf * (rs * rs * rs))

        # mt[k, b] = sum_a pos[a,k]*inv[a,b]   (rows 0..d-1)
        # mt[d, b] = sum_a inv[a,b]            (rowsum via the permanent ones row)
        mt = jnp.dot(aug, inv, preferred_element_type=jnp.float32,
                     precision=_MATMUL_PRECISION)                 # (d+1, n_pad)

        # acc[k,b] = pos[b,k]*rowsum(inv)[b] - (inv@pos)[b,k];  ones row -> exactly 0.
        acc = aug * mt[d:d + 1, :] - mt
        vel = vel - dtf * acc                 # last row stays 0
        aug = aug + dtf * vel                 # ones row stays 1
        return aug, vel

    carry = (aug_ref[...], vel_ref[...])
    if num_steps <= 8:
        for _ in range(num_steps):            # full unroll for small static step counts
            carry = step(carry)
    else:
        carry = lax.fori_loop(0, num_steps, lambda _, c: step(c), carry, unroll=4)

    aug, vel = carry
    pos_out_ref[...] = aug[:d, :]              # (d, n_pad) lane-dense stores
    vel_out_ref[...] = vel[:d, :]


def _single_block_call(params, aug, vel_aug, n, d, num_steps):
    n_pad = aug.shape[1]
    kernel = functools.partial(_nbody_fused_kernel, n=n, d=d, num_steps=num_steps)
    smem = pl.BlockSpec(memory_space=pltpu.MemorySpace.SMEM)
    vmem = pl.BlockSpec(memory_space=pltpu.MemorySpace.VMEM)
    return pl.pallas_call(
        kernel,
        out_shape=(jax.ShapeDtypeStruct((d, n_pad), jnp.float32),
                   jax.ShapeDtypeStruct((d, n_pad), jnp.float32)),
        in_specs=[smem, vmem, vmem],
        out_specs=(vmem, vmem),
    )(params, aug, vel_aug)


# --------------------------------------------------------------------------------------
# Row-tiled kernel for large n: grid = (n/T_i ["parallel"], n/T_j ["arbitrary"]).
# Accumulates mt = sum_j aug[:, j-tile] @ inv(j-tile, i-tile) in a (d+1, T_i) scratch.
# --------------------------------------------------------------------------------------
def _nbody_tiled_kernel(params_ref, aug_i_ref, aug_j_ref, vel_ref,
                        pos_out_ref, vel_out_ref, acc_ref, *, n, d):
    Gf = params_ref[0]
    dtf = params_ref[1]
    base = params_ref[2]
    tile_i = aug_i_ref.shape[1]
    tile_j = aug_j_ref.shape[1]
    j_idx = pl.program_id(1)

    @pl.when(j_idx == 0)
    def _():
        acc_ref[...] = jnp.zeros_like(acc_ref)

    aug_i = aug_i_ref[...]                                        # (d+1, tile_i)
    aug_j = aug_j_ref[...]                                        # (d+1, tile_j)
    pos_j_col = jnp.transpose(aug_j)                              # (tile_j, d+1)

    gi = pl.program_id(0) * tile_i + lax.broadcasted_iota(jnp.int32, (tile_j, tile_i), 1)
    gj = j_idx * tile_j + lax.broadcasted_iota(jnp.int32, (tile_j, tile_i), 0)
    mask = (gi == gj) | (gi >= n) | (gj >= n)

    dx = pos_j_col[:, 0:1] - aug_i[0:1, :]
    r2 = dx * dx + base
    for k in range(1, d):
        dxk = pos_j_col[:, k:k + 1] - aug_i[k:k + 1, :]
        r2 = r2 + dxk * dxk
    rs = lax.rsqrt(r2)
    inv = jnp.where(mask, jnp.float32(0.0), Gf * (rs * rs * rs))  # (tile_j, tile_i)

    acc_ref[...] += jnp.dot(aug_j, inv, preferred_element_type=jnp.float32,
                            precision=_MATMUL_PRECISION)          # (d+1, tile_i)

    @pl.when(j_idx == pl.num_programs(1) - 1)
    def _():
        mt = acc_ref[...]
        pos_i = aug_i[:d, :]
        acc_t = pos_i * mt[d:d + 1, :] - mt[:d, :]
        new_vel = vel_ref[...] - dtf * acc_t
        vel_out_ref[...] = new_vel
        pos_out_ref[...] = pos_i + dtf * new_vel


def _tiled_call(params, aug, vel_t, n, d, tile):
    n_pad = aug.shape[1]
    grid = (n_pad // tile, n_pad // tile)
    kernel = functools.partial(_nbody_tiled_kernel, n=n, d=d)
    return pl.pallas_call(
        kernel,
        out_shape=(jax.ShapeDtypeStruct((d, n_pad), jnp.float32),
                   jax.ShapeDtypeStruct((d, n_pad), jnp.float32)),
        grid=grid,
        in_specs=[
            pl.BlockSpec(memory_space=pltpu.MemorySpace.SMEM),          # scalar params
            pl.BlockSpec((d + 1, tile), lambda i, j: (0, i)),           # output bodies
            pl.BlockSpec((d + 1, tile), lambda i, j: (0, j)),           # partner bodies
            pl.BlockSpec((d, tile), lambda i, j: (0, i)),               # velocities
        ],
        out_specs=(pl.BlockSpec((d, tile), lambda i, j: (0, i)),
                   pl.BlockSpec((d, tile), lambda i, j: (0, i))),
        scratch_shapes=[pltpu.VMEM((d + 1, tile), jnp.float32)],
        compiler_params=pltpu.CompilerParams(
            dimension_semantics=("parallel", "arbitrary"),
            vmem_limit_bytes=48 * 1024 * 1024),
    )(params, aug, aug, vel_t)


# --------------------------------------------------------------------------------------
# Wrapper
# --------------------------------------------------------------------------------------
def nbody_step(space, G, dt, softening, num_steps=1, *, block=None):
    """space: (n, d, 2) f32 -> updated (n, d, 2) f32 after `num_steps` timesteps."""
    n, d, two = space.shape
    assert two == 2
    space = space.astype(jnp.float32)
    num_steps = int(num_steps)

    n_pad = _round_up(max(n, 1), _LANES)
    pos_t = _pad_lanes(jnp.transpose(space[..., 0]), n_pad)       # (d, n_pad)
    vel_t = _pad_lanes(jnp.transpose(space[..., 1]), n_pad)       # (d, n_pad)
    ones = _pad_lanes(jnp.ones((1, n), jnp.float32), n_pad)       # ones only on real bodies
    # Scalars go through SMEM so new (G, dt, softening) values don't recompile.
    params = jnp.array([G, dt, d * softening], dtype=jnp.float32)

    use_tiled = (block is not None) or (n_pad > _SINGLE_BLOCK_MAX_N)

    if not use_tiled:
        aug = jnp.concatenate([pos_t, ones], axis=0)              # (d+1, n_pad)
        vel_aug = jnp.concatenate([vel_t, jnp.zeros((1, n_pad), jnp.float32)], axis=0)
        new_pos_t, new_vel_t = _single_block_call(params, aug, vel_aug, n, d, num_steps)
    else:
        if block is not None:
            tile = int(block)
        else:
            tile = 256 if n_pad % 256 == 0 else 128   # 256 for v6e/v7x MXU; 128 is v5e-safe
        assert tile % _LANES == 0 and n_pad % tile == 0
        new_pos_t, new_vel_t = pos_t, vel_t
        for _ in range(num_steps):                    # tiled path: one pallas_call per step
            aug = jnp.concatenate([new_pos_t, ones], axis=0)
            new_pos_t, new_vel_t = _tiled_call(params, aug, new_vel_t, n, d, tile)

    new_pos = jnp.transpose(new_pos_t[:, :n])
    new_vel = jnp.transpose(new_vel_t[:, :n])
    return jnp.stack([new_pos, new_vel], axis=-1)


def nbody_ref(space, G, dt, softening):
    """Pure-JAX reference mirroring the PyTorch forward exactly."""
    pos = space[..., 0]
    vel = space[..., 1]
    n, _ = pos.shape
    dx = pos[:, None, :] - pos[None, :, :]
    r2 = jnp.sum(dx * dx + softening, axis=-1)
    r3 = r2 * jnp.sqrt(r2)
    idx = jnp.arange(n)
    r3 = r3.at[idx, idx].set(jnp.inf)
    x = dx * (G / r3)[..., None]
    new_vel = vel - dt * jnp.sum(x, axis=1)
    new_pos = pos + dt * new_vel
    return jnp.stack([new_pos, new_vel], axis=-1)


if __name__ == "__main__":
    key = jax.random.PRNGKey(0)
    G, dt, softening = 1.0, 0.01, 0.1
    d = 3
    kp, kv, kp2, kv2 = jax.random.split(key, 4)

    # --- small system: single-block fused path (bodies padded to 128 lanes) ---
    n = 64
    pos0 = jax.random.normal(kp, (n, d), dtype=jnp.float32)
    vel0 = 0.1 * jax.random.normal(kv, (n, d), dtype=jnp.float32)
    space = jnp.stack([pos0, vel0], axis=-1)                       # (n, d, 2)

    out = jax.block_until_ready(nbody_step(space, G, dt, softening))
    ref = jax.block_until_ready(nbody_ref(space, G, dt, softening))
    assert out.shape == (n, d, 2) and out.dtype == jnp.float32
    assert jnp.allclose(out, ref, rtol=2e-3, atol=2e-3), "single-step mismatch vs reference"

    # fused multi-step path (state stays resident inside one pallas_call)
    steps = 3
    out_ms = jax.block_until_ready(nbody_step(space, G, dt, softening, num_steps=steps))
    ref_ms = space
    for _ in range(steps):
        ref_ms = nbody_ref(ref_ms, G, dt, softening)
    ref_ms = jax.block_until_ready(ref_ms)
    assert jnp.allclose(out_ms, ref_ms, rtol=5e-3, atol=5e-3), "multi-step mismatch vs reference"

    # --- larger, non-multiple-of-128 system: row-tiled grid path ---
    n2 = 192
    pos1 = jax.random.normal(kp2, (n2, d), dtype=jnp.float32)
    vel1 = 0.1 * jax.random.normal(kv2, (n2, d), dtype=jnp.float32)
    space2 = jnp.stack([pos1, vel1], axis=-1)
    out2 = jax.block_until_ready(nbody_step(space2, G, dt, softening, block=128))
    ref2 = jax.block_until_ready(nbody_ref(space2, G, dt, softening))
    assert jnp.allclose(out2, ref2, rtol=3e-3, atol=3e-3), "tiled-path mismatch vs reference"

    print("KERNEL_OK")
</pallas_src>

<mosaic_0001>
module attributes {stable_mosaic.version = 11 : i64} {
  func.func @_nbody_fused_kernel(%arg0: memref<3xf32, #tpu.memory_space<smem>>, %arg1: memref<4x128xf32, #tpu.memory_space<vmem>>, %arg2: memref<4x128xf32, #tpu.memory_space<vmem>>, %arg3: memref<3x128xf32, #tpu.memory_space<vmem>>, %arg4: memref<3x128xf32, #tpu.memory_space<vmem>>) attributes {dimension_semantics = [], scalar_prefetch = 0 : i64, scratch_operands = 0 : i64, tpu.core_type = #tpu.core_type<tc>} {
    %c0 = arith.constant 0 : index
    %0 = memref.load %arg0[%c0] : memref<3xf32, #tpu.memory_space<smem>>
    %c1 = arith.constant 1 : index
    %1 = memref.load %arg0[%c1] : memref<3xf32, #tpu.memory_space<smem>>
    %c2 = arith.constant 2 : index
    %2 = memref.load %arg0[%c2] : memref<3xf32, #tpu.memory_space<smem>>
    %3 = tpu.iota {dimensions = array<i32: 0>} : vector<128x128xi32>
    %4 = tpu.iota {dimensions = array<i32: 1>} : vector<128x128xi32>
    %5 = arith.cmpi eq, %3, %4 : vector<128x128xi32>
    %c64_i32 = arith.constant 64 : i32
    %6 = vector.broadcast %c64_i32 : i32 to vector<128x128xi32>
    %7 = arith.cmpi sge, %3, %6 : vector<128x128xi32>
    %8 = arith.ori %5, %7 : vector<128x128xi1>
    %c64_i32_0 = arith.constant 64 : i32
    %9 = vector.broadcast %c64_i32_0 : i32 to vector<128x128xi32>
    %10 = arith.cmpi sge, %4, %9 : vector<128x128xi32>
    %11 = arith.ori %8, %10 : vector<128x128xi1>
    %c0_1 = arith.constant 0 : index
    %c0_2 = arith.constant 0 : index
    %12 = vector.load %arg1[%c0_1, %c0_2] : memref<4x128xf32, #tpu.memory_space<vmem>>, vector<4x128xf32>
    %c0_3 = arith.constant 0 : index
    %c0_4 = arith.constant 0 : index
    %13 = vector.load %arg2[%c0_3, %c0_4] : memref<4x128xf32, #tpu.memory_space<vmem>>, vector<4x128xf32>
    %14 = tpu.transpose %12, [1, 0] : vector<4x128xf32> -> vector<128x4xf32>
    %15 = vector.extract_strided_slice %14 {offsets = [0, 0], sizes = [128, 1], strides = [1, 1]} : vector<128x4xf32> to vector<128x1xf32>
    %16 = vector.extract_strided_slice %12 {offsets = [0, 0], sizes = [1, 128], strides = [1, 1]} : vector<4x128xf32> to vector<1x128xf32>
    %17 = vector.broadcast %15 : vector<128x1xf32> to vector<128x128xf32>
    %18 = vector.broadcast %16 : vector<1x128xf32> to vector<128x128xf32>
    %19 = arith.subf %17, %18 : vector<128x128xf32>
    %20 = arith.mulf %19, %19 : vector<128x128xf32>
    %21 = vector.broadcast %2 : f32 to vector<128x128xf32>
    %22 = arith.addf %20, %21 : vector<128x128xf32>
    %23 = vector.extract_strided_slice %14 {offsets = [0, 1], sizes = [128, 1], strides = [1, 1]} : vector<128x4xf32> to vector<128x1xf32>
    %24 = vector.extract_strided_slice %12 {offsets = [1, 0], sizes = [1, 128], strides = [1, 1]} : vector<4x128xf32> to vector<1x128xf32>
    %25 = vector.broadcast %23 : vector<128x1xf32> to vector<128x128xf32>
    %26 = vector.broadcast %24 : vector<1x128xf32> to vector<128x128xf32>
    %27 = arith.subf %25, %26 : vector<128x128xf32>
    %28 = arith.mulf %27, %27 : vector<128x128xf32>
    %29 = arith.addf %22, %28 : vector<128x128xf32>
    %30 = vector.extract_strided_slice %14 {offsets = [0, 2], sizes = [128, 1], strides = [1, 1]} : vector<128x4xf32> to vector<128x1xf32>
    %31 = vector.extract_strided_slice %12 {offsets = [2, 0], sizes = [1, 128], strides = [1, 1]} : vector<4x128xf32> to vector<1x128xf32>
    %32 = vector.broadcast %30 : vector<128x1xf32> to vector<128x128xf32>
    %33 = vector.broadcast %31 : vector<1x128xf32> to vector<128x128xf32>
    %34 = arith.subf %32, %33 : vector<128x128xf32>
    %35 = arith.mulf %34, %34 : vector<128x128xf32>
    %36 = arith.addf %29, %35 : vector<128x128xf32>
    %37 = math.rsqrt %36 : vector<128x128xf32>
    %38 = arith.mulf %37, %37 : vector<128x128xf32>
    %39 = arith.mulf %38, %37 : vector<128x128xf32>
    %40 = vector.broadcast %0 : f32 to vector<128x128xf32>
    %41 = arith.mulf %40, %39 : vector<128x128xf32>
    %cst = arith.constant 0.000000e+00 : f32
    %42 = vector.broadcast %cst : f32 to vector<128x128xf32>
    %43 = arith.select %11, %42, %41 : vector<128x128xi1>, vector<128x128xf32>
    %cst_5 = arith.constant dense<0.000000e+00> : vector<4x128xf32>
    %44 = tpu.matmul %12, %43, %cst_5 {dimension_numbers = #tpu.dot_dimension_numbers<[1], [0], [0], [1], [0, 0, 1, 1], [], []>} : vector<4x128xf32>, vector<128x128xf32>, vector<4x128xf32> -> vector<4x128xf32>
    %45 = vector.extract_strided_slice %44 {offsets = [3, 0], sizes = [1, 128], strides = [1, 1]} : vector<4x128xf32> to vector<1x128xf32>
    %46 = vector.broadcast %45 : vector<1x128xf32> to vector<4x128xf32>
    %47 = arith.mulf %12, %46 : vector<4x128xf32>
    %48 = arith.subf %47, %44 : vector<4x128xf32>
    %49 = vector.broadcast %1 : f32 to vector<4x128xf32>
    %50 = arith.mulf %49, %48 : vector<4x128xf32>
    %51 = arith.subf %13, %50 : vector<4x128xf32>
    %52 = vector.broadcast %1 : f32 to vector<4x128xf32>
    %53 = arith.mulf %52, %51 : vector<4x128xf32>
    %54 = arith.addf %12, %53 : vector<4x128xf32>
    %55 = vector.extract_strided_slice %54 {offsets = [0, 0], sizes = [3, 128], strides = [1, 1]} : vector<4x128xf32> to vector<3x128xf32>
    %c0_6 = arith.constant 0 : index
    %c0_7 = arith.constant 0 : index
    %56 = vector.load %arg3[%c0_6, %c0_7] : memref<3x128xf32, #tpu.memory_space<vmem>>, vector<3x128xf32>
    tpu.vector_store %arg3[%c0_6, %c0_7], %55 {strides = array<i32>} : memref<3x128xf32, #tpu.memory_space<vmem>>, vector<3x128xf32>,
    %57 = vector.extract_strided_slice %51 {offsets = [0, 0], sizes = [3, 128], strides = [1, 1]} : vector<4x128xf32> to vector<3x128xf32>
    %c0_8 = arith.constant 0 : index
    %c0_9 = arith.constant 0 : index
    %58 = vector.load %arg4[%c0_8, %c0_9] : memref<3x128xf32, #tpu.memory_space<vmem>>, vector<3x128xf32>
    tpu.vector_store %arg4[%c0_8, %c0_9], %57 {strides = array<i32>} : memref<3x128xf32, #tpu.memory_space<vmem>>, vector<3x128xf32>,
    return
  }
}

</mosaic_0001>

<bundles_post_ra>
// kernel: tpu_custom_call.1
= control target key start
LH: loop header
LB: loop body
LE: loop exit
PB: predicated region body
PF: predicated region fallthrough
CT: control target
= control target key end

     0   :  { %10 = vsyncpa [#allocation5], 0  ;;  %s1115_s0 = inlined_call_operand.hbm [shape: f32[3], index: 0, kind: input, shape index: {}]   ;;  %s1116_s1 = inlined_call_operand.hbm [shape: f32[4,128], index: 1, kind: input, shape index: {}]   ;;  %s1117_s2 = inlined_call_operand.hbm [shape: f32[4,128], index: 2, kind: input, shape index: {}]   ;;  %s1118_s3 = inlined_call_operand.hbm [shape: f32[3,128], index: 3, kind: output, shape index: {0}]   ;;  %s1119_s4 = inlined_call_operand.hbm [shape: f32[3,128], index: 4, kind: output, shape index: {1}]  }
   0x1   :  { %11 = vsyncpa [#allocation3], 0 }
   0x2   :  { %12 = vsyncpa [#allocation8], 0 }
   0x3   :  { %13 = vsyncpa [#allocation4], 0 }
   0x4   :  { %14 = vsyncpa [#allocation11], 0  ;;  %s925_s15 = smov [#allocation2]   ;;  %s926_s18 = smov [#allocation6]  }
   0x5   :  { %22 = dma.hbm_to_smem %s1115_s0, 16, %s925_s15, [#allocation5]  }
   0x6   :  { %s29_s19 = sshll.u32 %s926_s18, 4  ;;  %s927_s20 = smov [#allocation7]   ;;  %s30_s19 = int_to_ptr.vmem [resolvable:$true] %s29_s19 }
   0x7   :  { %s39_s21 = sshll.u32 %s927_s20, 4  ;;  %s843_s22 = scalar_lea.vmem %s30_s19, 64  ;;  %s40_s21 = int_to_ptr.vmem [resolvable:$true] %s39_s21 }
   0x8   :  { %p844_p0 = scmp.ne.s32.totalorder %s30_s19, %s843_s22  ;;  %p848_p1 = scmp.lt.s32.totalorder %s30_s19, %s30_s19 }
   0x9   :  { %p849_p2 = scmp.lt.s32.totalorder %s843_s22, %s843_s22 }
   0xb   :  { %p850_p3 = por %p849_p2, %p848_p1 }
   0xd   :  { %p851_p4 = pnand %p850_p3, %p844_p0 }
   0xf   :  { %854 = shalt.err (!%p851_p4)
}
  0x10   :  { %32 = dma.hbm_to_vmem [thread:$0]  %s1116_s1, 64, %s30_s19, [#allocation3]  }
  0x11   :  { %s863_s25 = scalar_lea.vmem %s40_s21, 64  ;;  %p868_p6 = scmp.lt.s32.totalorder %s40_s21, %s40_s21 }
  0x12   :  { %p864_p5 = scmp.ne.s32.totalorder %s40_s21, %s863_s25  ;;  %p869_p7 = scmp.lt.s32.totalorder %s863_s25, %s863_s25 }
  0x14   :  { %p870_p8 = por %p869_p7, %p868_p6 }
  0x16   :  { %p871_p9 = pnand %p870_p8, %p864_p5 }
  0x18   :  { %874 = shalt.err (!%p871_p9)
}
  0x19   :  { %42 = dma.hbm_to_vmem [thread:$0]  %s1117_s2, 64, %s40_s21, [#allocation8]  }
  0x1a   :  { %915 = dma.done.wait [#allocation5], 16  }
  0x1b   :  { %916 = vsyncadd [#allocation5], 4294967280 }
  0x1c   :  { %917 = dma.done.wait [#allocation3], 64  }
  0x1d   :  { %918 = vsyncadd [#allocation3], 4294967232 }
  0x1e   :  { %919 = dma.done.wait [#allocation8], 64  }
  0x1f   :  { %920 = vsyncadd [#allocation8], 4294967232 }
  0x20   :  { %52 = sfence }
  0x21   :  { %v969_v0 = vld [vmem:[#allocation6] sm:$0xf]  ;;  %v928_v1 = vmov 0   ;;  %v929_v10 = vmov 1   ;;  %v930_v11 = vmov 2   ;;  %v931_v12 = vmov 0.0  }
  0x22   :  { %142 = vxpose.xlu0.b32.start.end [1/1] (short) (narrow) %v969_v0, 64  ;;  %791 = vset.pattern.permute.xlu1 %v928_v1  ;;  %vm932_vm0 = vmmov 0   ;;  %v56_v24 = vlaneseq  ;;  %s735_s1 = sld [smem:[#allocation2 + $0x2]]  ;;  %s933_s28 = smov [#allocation10]  }
  0x23   :  { %761 = vmatprep.subr.mxu0 %v931_v12  ;;  %777 = vmatprep.mubr.msk.f32.mxu0 %vm932_vm0, %v931_v12  ;;  %s53_s2 = sld [smem:[#allocation2]]  ;;  %s719_s29 = sshll.u32 %s933_s28, 4  ;;  %s720_s29 = int_to_ptr.vmem [resolvable:$true] %s719_s29 }
  0x24   :  { %v975_v26 = vshrl.u32 %v56_v24, 7  ;;  %s734_s27 = sld [smem:[#allocation2 + $0x1]]  ;;  %s934_s30 = smov [#allocation9]  }
  0x25   :  { %s709_s5 = sshll.u32 %s934_s30, 4  ;;  %s875_s6 = scalar_lea.vmem %s720_s29, 64  ;;  %s710_s5 = int_to_ptr.vmem [resolvable:$true] %s709_s5 }
  0x26   :  { %v256_v28 = vsub.s32 0, %v975_v26  ;;  %v373_v29 = vsub.s32 1, %v975_v26  ;;  %v489_v33 = vsub.s32 2, %v975_v26  ;;  %p876_p10 = scmp.ne.s32.totalorder %s720_s29, %s875_s6  ;;  %p880_p11 = scmp.lt.s32.totalorder %s720_s29, %s720_s29 }
  0x27   :  { %p881_p12 = scmp.lt.s32.totalorder %s875_s6, %s875_s6 }
  0x28   :  { %v982_v31 = vrot.slane %v969_v0, %v256_v28  ;;  %v985_v32 = vrot.slane %v969_v0, %v373_v29  ;;  %v990_v36 = vrot.slane %v969_v0, %v489_v33  ;;  %v994_v41 = vstv %s735_s1 }
  0x29   :  { %p882_p13 = por %p881_p12, %p880_p11 }
  0x2b   :  { %p883_p0 = pnand %p882_p13, %p876_p10 }
  0x4b   :  { %790 = vset.pattern.permute.xlu0 %v928_v1 }
  0x9e   :  { %v158_v2 = vpop.trf.xlu0 }
  0xa2   :  { %v159_v3 = vpop.trf.xlu0 }
  0xa6   :  { %v160_v4 = vpop.trf.xlu0 }
  0xaa   :  { %v161_v5 = vpop.trf.xlu0 }
  0xae   :  { %v162_v6 = vpop.trf.xlu0 }
  0xb2   :  { %v163_v7 = vpop.trf.xlu0 }
  0xb6   :  { %v164_v8 = vpop.trf.xlu0 }
  0xb7   :  { %206 = vperm.xlu1 %791, %v164_v8  }
  0xba   :  { %v165_v9 = vpop.trf.xlu0 }
  0xbb   :  { %201 = vperm.xlu1 %791, %v163_v7   ;;  %211 = vperm.xlu0 %790, %v165_v9  }
  0xbf   :  { %792 = vset.pattern.permute.xlu1 %v929_v10  ;;  %809 = vset.pattern.permute.xlu0 %v930_v11 }
  0xc0   :  { %332 = vperm.xlu1 %792, %v164_v8   ;;  %432 = vperm.xlu0 %809, %v160_v4  }
  0xc4   :  { %793 = vset.pattern.permute.xlu1 %v928_v1  ;;  %424 = vperm.xlu0 %809, %v158_v2  }
  0xc5   :  { %196 = vperm.xlu1 %793, %v162_v6  }
  0xc9   :  { %794 = vset.pattern.permute.xlu1 %v929_v10 }
  0xca   :  { %328 = vperm.xlu1 %794, %v163_v7  }
  0xce   :  { %795 = vset.pattern.permute.xlu1 %v930_v11 }
  0xcf   :  { %448 = vperm.xlu1 %795, %v164_v8  }
  0xd3   :  { %796 = vset.pattern.permute.xlu1 %v928_v1 }
  0xd4   :  { %191 = vperm.xlu1 %796, %v161_v5  }
  0xd8   :  { %797 = vset.pattern.permute.xlu1 %v929_v10 }
  0xd9   :  { %324 = vperm.xlu1 %797, %v162_v6  }
  0xdd   :  { %798 = vset.pattern.permute.xlu1 %v930_v11 }
  0xde   :  { %444 = vperm.xlu1 %798, %v163_v7  }
  0xe2   :  { %799 = vset.pattern.permute.xlu1 %v928_v1 }
  0xe3   :  { %186 = vperm.xlu1 %799, %v160_v4  }
  0xe7   :  { %800 = vset.pattern.permute.xlu1 %v929_v10 }
  0xe8   :  { %320 = vperm.xlu1 %800, %v161_v5  }
  0xec   :  { %801 = vset.pattern.permute.xlu1 %v930_v11 }
  0xed   :  { %440 = vperm.xlu1 %801, %v162_v6  }
  0xf1   :  { %802 = vset.pattern.permute.xlu1 %v928_v1 }
  0xf2   :  { %181 = vperm.xlu1 %802, %v159_v3  }
  0xf6   :  { %803 = vset.pattern.permute.xlu1 %v929_v10 }
  0xf7   :  { %316 = vperm.xlu1 %803, %v160_v4  }
  0xfb   :  { %804 = vset.pattern.permute.xlu1 %v930_v11 }
  0xfc   :  { %436 = vperm.xlu1 %804, %v161_v5  }
 0x100   :  { %805 = vset.pattern.permute.xlu1 %v928_v1 }
 0x101   :  { %176 = vperm.xlu1 %805, %v158_v2  }
 0x105   :  { %806 = vset.pattern.permute.xlu1 %v929_v10 }
 0x106   :  { %336 = vperm.xlu1 %806, %v165_v9  }
 0x10a   :  { %807 = vset.pattern.permute.xlu1 %v930_v11 }
 0x10b   :  { %452 = vperm.xlu1 %807, %v165_v9  }
 0x10f   :  { %808 = vset.pattern.permute.xlu1 %v929_v10 }
 0x110   :  { %312 = vperm.xlu1 %808, %v159_v3  }
 0x114   :  { %308 = vperm.xlu1 %808, %v158_v2  }
 0x118   :  { %810 = vset.pattern.permute.xlu1 %v930_v11 }
 0x119   :  { %428 = vperm.xlu1 %810, %v159_v3  }
 0x132   :  { %v207_v13 = vpop.permute.xlu1 %206 }
 0x133   :  { %v264_v34 = vsub.f32 %v207_v13, %v982_v31 }
 0x135   :  { %v280_v38 = vmul.f32 %v264_v34, %v264_v34 }
 0x136   :  { %v202_v14 = vpop.permute.xlu1 %201  ;;  %v212_v40 = vpop.permute.xlu0 %211 }
 0x137   :  { %v263_v39 = vsub.f32 %v202_v14, %v982_v31  ;;  %v265_v42 = vsub.f32 %v212_v40, %v982_v31  ;;  %v297_v50 = vadd.f32 %v994_v41, %v280_v38 }
 0x139   :  { %v279_v51 = vmul.f32 %v263_v39, %v263_v39  ;;  %v281_v54 = vmul.f32 %v265_v42, %v265_v42 }
 0x13b   :  { %v333_v15 = vpop.permute.xlu1 %332  ;;  %v296_v3 = vadd.f32 %v994_v41, %v279_v51  ;;  %v433_v4 = vpop.permute.xlu0 %432  ;;  %v298_v8 = vadd.f32 %v994_v41, %v281_v54 }
 0x13c   :  { %v381_v37 = vsub.f32 %v333_v15, %v985_v32 }
 0x13e   :  { %v397_v47 = vmul.f32 %v381_v37, %v381_v37 }
 0x13f   :  { %v425_v42 = vpop.permute.xlu0 %424 }
 0x140   :  { %v197_v16 = vpop.permute.xlu1 %196  ;;  %v413_v62 = vadd.f32 %v397_v47, %v297_v50 }
 0x141   :  { %v262_v43 = vsub.f32 %v197_v16, %v982_v31 }
 0x143   :  { %v278_v55 = vmul.f32 %v262_v43, %v262_v43 }
 0x145   :  { %v329_v17 = vpop.permute.xlu1 %328  ;;  %v295_v9 = vadd.f32 %v994_v41, %v278_v55 }
 0x146   :  { %v380_v46 = vsub.f32 %v329_v17, %v985_v32  ;;  %v493_v17 = vsub.f32 %v433_v4, %v990_v36 }
 0x148   :  { %v396_v58 = vmul.f32 %v380_v46, %v380_v46  ;;  %v509_v37 = vmul.f32 %v493_v17, %v493_v17 }
 0x14a   :  { %v449_v18 = vpop.permute.xlu1 %448  ;;  %v412_v13 = vadd.f32 %v396_v58, %v296_v3 }
 0x14b   :  { %v497_v44 = vsub.f32 %v449_v18, %v990_v36 }
 0x14d   :  { %v513_v56 = vmul.f32 %v497_v44, %v497_v44 }
 0x14f   :  { %v192_v19 = vpop.permute.xlu1 %191  ;;  %v529_v10 = vadd.f32 %v513_v56, %v413_v62  ;;  %v1026_v56 = vand.u32 127, %v56_v24  ;;  %v62_v24 = vadd.s32 40, %v975_v26 }
 0x150   :  { %v261_v48 = vsub.f32 %v192_v19, %v982_v31 }
 0x151   :  { %811 = vrsqrt.f32 %v529_v10  ;;  %vm123_vm2 = vcmp.ge.s32.totalorder %v1026_v56, 64  ;;  %vm80_vm5 = vcmp.eq.s32.totalorder %v62_v24, %v1026_v56 }
 0x152   :  { %v277_v63 = vmul.f32 %v261_v48, %v261_v48  ;;  %vm1056_vm9 = vmor %vm80_vm5, %vm123_vm2 }
 0x153   :  { %vm740_vm13 = vmneg %vm1056_vm9 }
 0x154   :  { %v325_v20 = vpop.permute.xlu1 %324  ;;  %v294_v18 = vadd.f32 %v994_v41, %v277_v63 }
 0x155   :  { %v379_v49 = vsub.f32 %v325_v20, %v985_v32 }
 0x157   :  { %v395_v1 = vmul.f32 %v379_v49, %v379_v49  ;;  %v491_v49 = vsub.f32 %v425_v42, %v990_v36 }
 0x159   :  { %v445_v21 = vpop.permute.xlu1 %444  ;;  %v411_v19 = vadd.f32 %v395_v1, %v295_v9  ;;  %v507_v54 = vmul.f32 %v491_v49, %v491_v49 }
 0x15a   :  { %v496_v52 = vsub.f32 %v445_v21, %v990_v36 }
 0x15c   :  { %v512_v5 = vmul.f32 %v496_v52, %v496_v52 }
 0x15e   :  { %v187_v22 = vpop.permute.xlu1 %186  ;;  %v528_v21 = vadd.f32 %v512_v5, %v412_v13 }
 0x15f   :  { %v260_v53 = vsub.f32 %v187_v22, %v982_v31 }
 0x160   :  { %813 = vrsqrt.f32 %v528_v21 }
 0x161   :  { %v276_v6 = vmul.f32 %v260_v53, %v260_v53 }
 0x163   :  { %v321_v23 = vpop.permute.xlu1 %320  ;;  %v293_v22 = vadd.f32 %v994_v41, %v276_v6 }
 0x164   :  { %v378_v59 = vsub.f32 %v321_v23, %v985_v32 }
 0x166   :  { %v394_v14 = vmul.f32 %v378_v59, %v378_v59 }
 0x168   :  { %v441_v25 = vpop.permute.xlu1 %440  ;;  %v410_v29 = vadd.f32 %v394_v14, %v294_v18 }
 0x169   :  { %v495_v57 = vsub.f32 %v441_v25, %v990_v36 }
 0x16b   :  { %v511_v11 = vmul.f32 %v495_v57, %v495_v57  ;;  %v812_v57 = vpop.eup %811 }
 0x16c   :  { %v561_v3 = vmul.f32 %v812_v57, %v812_v57 }
 0x16d   :  { %v977_v27 = vpop.permute.xlu1 %181  ;;  %v527_v28 = vadd.f32 %v511_v11, %v411_v19  ;;  %v814_v63 = vpop.eup %813 }
 0x16e   :  { %v259_v43 = vsub.f32 %v977_v27, %v982_v31  ;;  %v560_v6 = vmul.f32 %v814_v63, %v814_v63  ;;  %v577_v11 = vmul.f32 %v812_v57, %v561_v3 }
 0x16f   :  { %815 = vrsqrt.f32 %v527_v28  ;;  %v58_v28 = vadd.s32 8, %v975_v26 }
 0x170   :  { %v275_v50 = vmul.f32 %v259_v43, %v259_v43  ;;  %v576_v19 = vmul.f32 %v814_v63, %v560_v6 }
 0x172   :  { %v317_v30 = vpop.permute.xlu1 %316  ;;  %v292_v58 = vadd.f32 %v994_v41, %v275_v50 }
 0x173   :  { %v377_v60 = vsub.f32 %v317_v30, %v985_v32 }
 0x175   :  { %v393_v15 = vmul.f32 %v377_v60, %v377_v60  ;;  %v63_v60 = vadd.s32 48, %v975_v26 }
 0x177   :  { %v437_v35 = vpop.permute.xlu1 %436  ;;  %v409_v30 = vadd.f32 %v393_v15, %v293_v22  ;;  %vm81_vm3 = vcmp.eq.s32.totalorder %v63_v60, %v1026_v56  ;;  %v587_v15 = vstv %s53_s2 }
 0x178   :  { %v494_v7 = vsub.f32 %v437_v35, %v990_v36  ;;  %vm1046_vm6 = vmor %vm81_vm3, %vm123_vm2  ;;  %v594_v21 = vmul.f32 %v587_v15, %v577_v11 }
 0x179   :  { %v525_v44 = vadd.f32 %v509_v37, %v409_v30  ;;  %vm738_vm10 = vmneg %vm1046_vm6  ;;  %vm75_vm6 = vcmp.eq.s32.totalorder %v975_v26, %v1026_v56 }
 0x17a   :  { %v510_v23 = vmul.f32 %v494_v7, %v494_v7 }
 0x17c   :  { %v177_v45 = vpop.permute.xlu1 %176  ;;  %v526_v38 = vadd.f32 %v510_v23, %v410_v29  ;;  %v816_v1 = vpop.eup %815  ;;  %v593_v29 = vmul.f32 %v587_v15, %v576_v19 }
 0x17d   :  { %v258_v35 = vsub.f32 %v177_v45, %v982_v31  ;;  %v64_v31 = vadd.s32 56, %v975_v26  ;;  %v559_v13 = vmul.f32 %v816_v1, %v816_v1 }
 0x17f   :  { %v274_v46 = vmul.f32 %v258_v35, %v258_v35  ;;  %vm82_vm1 = vcmp.eq.s32.totalorder %v64_v31, %v1026_v56  ;;  %v575_v23 = vmul.f32 %v816_v1, %v559_v13 }
 0x180   :  { %vm1038_vm4 = vmor %vm82_vm1, %vm123_vm2 }
 0x181   :  { %v337_v61 = vpop.permute.xlu1 %336  ;;  %v291_v51 = vadd.f32 %v994_v41, %v274_v46  ;;  %vm736_vm7 = vmneg %vm1038_vm4  ;;  %v592_v35 = vmul.f32 %v587_v15, %v575_v23  ;;  %vm76_vm4 = vcmp.eq.s32.totalorder %v58_v28, %v1026_v56 }
 0x182   :  { %v382_v2 = vsub.f32 %v337_v61, %v985_v32 }
 0x184   :  { %v398_v16 = vmul.f32 %v382_v2, %v382_v2 }
 0x186   :  { %v453_v20 = vpop.permute.xlu1 %452  ;;  %v414_v33 = vadd.f32 %v398_v16, %v298_v8  ;;  %v60_v8 = vadd.s32 24, %v975_v26  ;;  %v59_v16 = vadd.s32 16, %v975_v26 }
 0x187   :  { %v498_v25 = vsub.f32 %v453_v20, %v990_v36 }
 0x188   :  { %vm78_vm11 = vcmp.eq.s32.totalorder %v60_v8, %v1026_v56  ;;  %vm77_vm14 = vcmp.eq.s32.totalorder %v59_v16, %v1026_v56 }
 0x189   :  { %v514_v34 = vmul.f32 %v498_v25, %v498_v25  ;;  %vm1076_vm15 = vmor %vm78_vm11, %vm123_vm2 }
 0x18a   :  { %vm1085_vm1 = vmor %vm77_vm14, %vm123_vm2 }
 0x18b   :  { %v530_v39 = vadd.f32 %v514_v34, %v414_v33  ;;  %v313_v40 = vpop.permute.xlu1 %312  ;;  %vm744_vm3 = vmneg %vm1076_vm15 }
 0x18c   :  { %v376_v47 = vsub.f32 %v313_v40, %v985_v32  ;;  %vm746_vm5 = vmneg %vm1085_vm1 }
 0x18d   :  { %817 = vrsqrt.f32 %v530_v39 }
 0x18e   :  { %819 = vrsqrt.f32 %v526_v38  ;;  %v392_v53 = vmul.f32 %v376_v47, %v376_v47 }
 0x18f   :  { %v309_v48 = vpop.permute.xlu1 %308  ;;  %821 = vrsqrt.f32 %v525_v44 }
 0x190   :  { %v375_v45 = vsub.f32 %v309_v48, %v985_v32  ;;  %v408_v61 = vadd.f32 %v392_v53, %v292_v58 }
 0x192   :  { %v391_v52 = vmul.f32 %v375_v45, %v375_v45  ;;  %v692_v45 = vsub.s32 3, %v975_v26 }
 0x194   :  { %v407_v55 = vadd.f32 %v391_v52, %v291_v51  ;;  %v429_v27 = vpop.permute.xlu1 %428 }
 0x195   :  { %v492_v59 = vsub.f32 %v429_v27, %v990_v36  ;;  %v61_v36 = vadd.s32 32, %v975_v26  ;;  %v141_v27 = vld [vmem:[#allocation7] sm:$0xf] }
 0x196   :  { %v523_v32 = vadd.f32 %v507_v54, %v407_v55  ;;  %v696_v54 = vstv %s734_s27 }
 0x197   :  { %v508_v62 = vmul.f32 %v492_v59, %v492_v59  ;;  %vm79_vm8 = vcmp.eq.s32.totalorder %v61_v36, %v1026_v56 }
 0x198   :  { %823 = vrsqrt.f32 %v523_v32  ;;  %vm1065_vm12 = vmor %vm79_vm8, %vm123_vm2 }
 0x199   :  { %v524_v2 = vadd.f32 %v508_v62, %v408_v61  ;;  %vm742_vm0 = vmneg %vm1065_vm12 }
 0x19a   :  { %v818_v41 = vpop.eup %817  ;;  %vm124_vm8 = vmor %vm75_vm6, %vm123_vm2 }
 0x19b   :  { %825 = vrsqrt.f32 %v524_v2  ;;  %v562_v5 = vmul.f32 %v818_v41, %v818_v41  ;;  %v820_v7 = vpop.eup %819 }
 0x19c   :  { %v822_v14 = vpop.eup %821  ;;  %v558_v20 = vmul.f32 %v820_v7, %v820_v7 }
 0x19d   :  { %v578_v9 = vmul.f32 %v818_v41, %v562_v5  ;;  %v557_v25 = vmul.f32 %v822_v14, %v822_v14 }
 0x19e   :  { %v574_v33 = vmul.f32 %v820_v7, %v558_v20 }
 0x19f   :  { %v595_v17 = vmul.f32 %v587_v15, %v578_v9  ;;  %v573_v38 = vmul.f32 %v822_v14, %v557_v25 }
 0x1a0   :  { %v591_v39 = vmul.f32 %v587_v15, %v574_v33 }
 0x1a1   :  { %762 = vmatpush3.msk.msra.mxu0 %vm736_vm7, %v595_v17  ;;  %v590_v43 = vmul.f32 %v587_v15, %v573_v38  ;;  %vm125_vm7 = vmor %vm76_vm4, %vm123_vm2 }
 0x1a2   :  { %763 = vmatprep.subr.mxu0 %v931_v12  ;;  %vm748_vm9 = vmneg %vm125_vm7 }
 0x1a3   :  { %764 = vmatpush3.msk.msra.mxu0 %vm738_vm10, %v594_v21  ;;  %vm750_vm10 = vmneg %vm124_vm8 }
 0x1a4   :  { %765 = vmatprep.subr.mxu0 %v931_v12 }
 0x1a5   :  { %v824_v34 = vpop.eup %823  ;;  %766 = vmatpush3.msk.msra.mxu0 %vm740_vm13, %v593_v29 }
 0x1a6   :  { %767 = vmatprep.subr.mxu0 %v931_v12  ;;  %v555_v40 = vmul.f32 %v824_v34, %v824_v34 }
 0x1a7   :  { %768 = vmatpush3.msk.msra.mxu0 %vm742_vm0, %v592_v35 }
 0x1a8   :  { %v826_v42 = vpop.eup %825  ;;  %769 = vmatprep.subr.mxu0 %v931_v12  ;;  %v571_v47 = vmul.f32 %v824_v34, %v555_v40 }
 0x1a9   :  { %770 = vmatpush3.msk.msra.mxu0 %vm744_vm3, %v591_v39  ;;  %v556_v44 = vmul.f32 %v826_v42, %v826_v42 }
 0x1aa   :  { %771 = vmatprep.subr.mxu0 %v931_v12  ;;  %v588_v49 = vmul.f32 %v587_v15, %v571_v47 }
 0x1ab   :  { %772 = vmatpush3.msk.msra.mxu0 %vm746_vm5, %v590_v43  ;;  %v572_v46 = vmul.f32 %v826_v42, %v556_v44 }
 0x1ac   :  { %773 = vmatprep.subr.mxu0 %v931_v12 }
 0x1ad   :  { %v589_v48 = vmul.f32 %v587_v15, %v572_v46 }
 0x1af   :  { %774 = vmatpush3.msk.msra.mxu0 %vm748_vm9, %v589_v48 }
 0x1b0   :  { %775 = vmatprep.subr.mxu0 %v931_v12 }
 0x1b1   :  { %776 = vmatpush3.msk.msra.mxu0 %vm750_vm10, %v588_v49 }
 0x1b2   :  { %778 = vmatmul.mubr.f32.vlgmr.msra.gmra.mxu0 %v969_v0 }
 0x272   :  { %v686_v50 = vpop.f32.mrf.mxu0 }
 0x273   :  { %v693_v51 = vrot.slane %v686_v50, %v692_v45 }
 0x274   :  { %v779_v52 = vpop.f32.mrf.mxu0 }
 0x275   :  { %v694_v53 = vmul.f32 %v693_v51, %v969_v0 }
 0x277   :  { %v695_v55 = vsub.f32 %v694_v53, %v686_v50 }
 0x279   :  { %v697_v31 = vmul.f32 %v696_v54, %v695_v55 }
 0x27b   :  { %v698_v56 = vsub.f32 %v141_v27, %v697_v31 }
 0x27d   :  { %v699_v12 = vmul.f32 %v698_v56, %v696_v54  ;;  %702 = vst [vmem:[#allocation10] sm:$0x7] %v698_v56 }
 0x27e   :  { %886 = shalt.err (!%p883_p0)
}
 0x27f   :  { %722 = dma.vmem_to_hbm [thread:$0]  %s720_s29, 64, %s1119_s4, [#allocation11]   ;;  %v700_v26 = vadd.f32 %v699_v12, %v969_v0 }
 0x280   :  { %s895_s9 = scalar_lea.vmem %s710_s5, 64  ;;  %p900_p2 = scmp.lt.s32.totalorder %s710_s5, %s710_s5 }
 0x281   :  { %701 = vst [vmem:[#allocation9] sm:$0x7] %v700_v26  ;;  %p896_p1 = scmp.ne.s32.totalorder %s710_s5, %s895_s9  ;;  %p901_p3 = scmp.lt.s32.totalorder %s895_s9, %s895_s9 }
 0x283   :  { %p902_p4 = por %p901_p3, %p900_p2 }
 0x285   :  { %p903_p5 = pnand %p902_p4, %p896_p1 }
 0x287   :  { %906 = shalt.err (!%p903_p5)
}
 0x288   :  { %712 = dma.vmem_to_hbm [thread:$0]  %s710_s5, 64, %s1118_s3, [#allocation4]  }
 0x289   :  { %921 = dma.done.wait [#allocation4], 64  }
 0x28a   :  { %922 = vsyncadd [#allocation4], 4294967232 }
 0x28b   :  { %923 = dma.done.wait [#allocation11], 64  }
 0x28c   :  { %924 = vsyncadd [#allocation11], 4294967232 }
 0x28d   :  { %729 = vsyncpa [#allocation3], 1 }
 0x28e   :  { %730 = vsyncpa [#allocation8], 1 }
 0x28f   :  { %731 = vsyncpa [#allocation4], 1 }
 0x290   :  { %732 = vsyncpa [#allocation11], 1 }
 0x291   :  { %733 = vsyncpa [#allocation5], 1 }

</bundles_post_ra>
